<compile_context>
chip_gen: v6e
topology: v6e:2x2x1
jax: 0.10.0
libtpu: 0.0.40
codegen_flags: <defaults>
</compile_context>

<pallas_src>
import jax
import jax.numpy as jnp
from jax.experimental import pallas as pl
from jax.experimental.pallas import tpu as pltpu


_BLOCK_BUDGET = 4 * 1024 * 1024       # target bytes for one input block
_VMEM_LIMIT = 32 * 1024 * 1024        # scoped-VMEM request (<= physical on v5e/v6e/v7x)


def _pair(v):
    if isinstance(v, (tuple, list)):
        assert len(v) == 2, v
        return int(v[0]), int(v[1])
    return int(v), int(v)


def _min_value(dtype):
    dtype = jnp.dtype(dtype)
    if jnp.issubdtype(dtype, jnp.integer):
        return jnp.array(jnp.iinfo(dtype).min, dtype=dtype)
    if dtype == jnp.bool_:
        return jnp.array(False, dtype=dtype)
    return jnp.array(-jnp.inf, dtype=dtype)


def _pick_tile(n, item_bytes, *, align, budget=_BLOCK_BUDGET):
    """Tile over a blocked axis of length `n` where one index costs `item_bytes` bytes.

    Returns a multiple of `align` or `n` itself (a block dim equal to the full array dim
    always satisfies the (8,128) rule).  Targets `budget` bytes per block and prefers an
    even number of grid steps (>= 2) so v7x's two TensorCores both get work, without
    shrinking blocks below ~1 MiB.  A pl.cdiv grid handles a ragged tail tile.
    """
    item_bytes = max(int(item_bytes), 1)
    if n <= align or n * item_bytes <= min(budget, 2 * 1024 * 1024):
        return n
    cap = max((budget // item_bytes) // align * align, align)
    if cap >= n:
        half = -(-n // (2 * align)) * align            # ceil(n/2), aligned up
        if half < n and half * item_bytes >= (1 << 20):
            return half                                # 2 even, still-large steps
        return n                                       # one big block
    min_tile = max(((1 << 20) // item_bytes) // align * align, align)
    t = cap
    while t - align >= min_tile and pl.cdiv(n, t) % 2 != 0:
        t -= align
    return t if pl.cdiv(n, t) % 2 == 0 else cap


# ----------------------- fast path: channel-only pooling ---------------------
# kernel_size = (1, kc), stride = (1, kc)  -- the configuration MMSMCNet uses.

def _channel_pool_kernel(x_ref, o_ref):
    """Max over kc channel taps folded into the lane dimension.

    x_ref: (tr, kc*L)  -- tr rows, each row = kc contiguous L-wide channel slabs.
    o_ref: (tr, L)
    """
    L = o_ref.shape[1]
    kc = x_ref.shape[1] // L
    acc = x_ref[:, pl.ds(0, L)]
    for j in range(1, kc):                      # static, tiny unroll (kc is small)
        acc = jnp.maximum(acc, x_ref[:, pl.ds(j * L, L)])
    o_ref[...] = acc


def _channel_max_pool_lane_dense(x, kc):
    B, C, H, W = x.shape
    C_out = C // kc
    L = H * W
    R = B * C_out
    itemsize = jnp.dtype(x.dtype).itemsize
    # Contiguous (bitcast) reshape: fold each group's kc channels into lanes and
    # flatten (batch, group) into one row axis so tiles can span batch.
    xg = x[:, : C_out * kc].reshape(R, kc * L)

    row_bytes = kc * L * itemsize
    tr = _pick_tile(R, row_bytes, align=8)

    out = pl.pallas_call(
        _channel_pool_kernel,
        out_shape=jax.ShapeDtypeStruct((R, L), x.dtype),
        grid=(pl.cdiv(R, tr),),
        in_specs=[pl.BlockSpec((tr, kc * L), lambda r: (r, 0))],
        out_specs=pl.BlockSpec((tr, L), lambda r: (r, 0)),
        compiler_params=pltpu.CompilerParams(
            dimension_semantics=("parallel",),
            vmem_limit_bytes=_VMEM_LIMIT),
        cost_estimate=pl.CostEstimate(
            flops=(kc - 1) * R * L,
            transcendentals=0,
            bytes_accessed=(kc + 1) * R * L * itemsize),
    )(xg)
    return out.reshape(B, C_out, H, W)


# ---- lane-tiled variant for very large feature maps (rows too big to fold) ----

def _channel_pool_acc_kernel(x_ref, o_ref):
    """One channel tap per step along the last ("arbitrary") grid axis; the output
    block stays resident in VMEM across that axis and is max-accumulated in place."""
    @pl.when(pl.program_id(2) == 0)
    def _():
        o_ref[...] = x_ref[...]

    @pl.when(pl.program_id(2) != 0)
    def _():
        o_ref[...] = jnp.maximum(o_ref[...], x_ref[...])


def _channel_max_pool_lane_tiled(x, kc, budget=_BLOCK_BUDGET):
    B, C, H, W = x.shape
    C_out = C // kc
    L = H * W
    R = B * C_out
    itemsize = jnp.dtype(x.dtype).itemsize
    assert L % 128 == 0, "lane-tiled path requires H*W to be a multiple of 128"
    xg = x[:, : C_out * kc].reshape(R, kc * L)

    # Largest multiple-of-128 lane tile that divides L and keeps an 8-row block in budget.
    units = L // 128
    tl = 128
    for d in range(units, 0, -1):
        if units % d == 0 and 8 * d * 128 * itemsize <= budget:
            tl = d * 128
            break
    nl = L // tl
    tr = _pick_tile(R, tl * itemsize, align=8, budget=budget)

    out = pl.pallas_call(
        _channel_pool_acc_kernel,
        out_shape=jax.ShapeDtypeStruct((R, L), x.dtype),
        grid=(pl.cdiv(R, tr), nl, kc),
        in_specs=[pl.BlockSpec((tr, tl), lambda r, l, j: (r, j * nl + l))],
        out_specs=pl.BlockSpec((tr, tl), lambda r, l, j: (r, l)),
        compiler_params=pltpu.CompilerParams(
            dimension_semantics=("parallel", "parallel", "arbitrary"),
            vmem_limit_bytes=_VMEM_LIMIT),
        cost_estimate=pl.CostEstimate(
            flops=(kc - 1) * R * L,
            transcendentals=0,
            bytes_accessed=(kc + 1) * R * L * itemsize),
    )(xg)
    return out.reshape(B, C_out, H, W)


def _channel_max_pool(x, kc):
    B, C, H, W = x.shape
    C_out = C // kc
    L = H * W
    R = B * C_out
    itemsize = jnp.dtype(x.dtype).itemsize
    row_bytes = kc * L * itemsize
    if min(R, 8) * row_bytes <= 2 * _BLOCK_BUDGET:
        return _channel_max_pool_lane_dense(x, kc)
    if L % 128 == 0:
        return _channel_max_pool_lane_tiled(x, kc)
    # TODO(synk): huge feature maps with H*W % 128 != 0 fall back to XLA reduce_window.
    return channel_max_pooling_ref(x, (1, kc), (1, kc))


# ------------------- general path: pooling over both H and C -----------------
# kernel_size = (kh, kc), stride = (kh, kc)  (non-overlapping windows).

def _grouped_pool_kernel(x_ref, o_ref):
    """x_ref: (TG, kc*H_out, kh*W); o_ref: (TG, H_out, W).

    Channel taps are contiguous H_out-tall sublane slabs (pure VPU max); height taps
    are contiguous W-wide lane slices of the reduced value."""
    H_out, W = o_ref.shape[1], o_ref.shape[2]
    kc = x_ref.shape[1] // H_out
    kh = x_ref.shape[2] // W
    acc = x_ref[:, 0:H_out, :]
    for j in range(1, kc):
        acc = jnp.maximum(acc, x_ref[:, j * H_out:(j + 1) * H_out, :])
    res = acc[:, :, 0:W]
    for i in range(1, kh):
        res = jnp.maximum(res, acc[:, :, i * W:(i + 1) * W])
    # TODO(synk): when W < 128 these stores are masked (sub-vreg); a fully lane-dense
    # (TG, H_out*W) output would need an in-kernel sublane->lane relayout.
    o_ref[...] = res


def _grouped_max_pool(x, kh, kc):
    B, C, H, W = x.shape
    C_out, H_out = C // kc, H // kh
    G = B * C_out
    itemsize = jnp.dtype(x.dtype).itemsize
    # Contiguous reshape: per group the window taps become (kc*H_out) sublanes and
    # (kh*W) lanes -- the densest layout reachable without a data-moving transpose.
    xg = x[:, : C_out * kc, : H_out * kh, :].reshape(G, kc * H_out, kh * W)

    def _padded(s, l):   # VMEM footprint of one group's slab, (8,128)-tile padded
        return (-(-s // 8) * 8) * (-(-l // 128) * 128) * itemsize

    per_group = _padded(kc * H_out, kh * W) + _padded(H_out, W)
    if per_group > 2 * _BLOCK_BUDGET:
        # TODO(synk): tile the H_out axis for extremely large feature maps instead of
        # falling back to XLA reduce_window.
        return channel_max_pooling_ref(x, (kh, kc), (kh, kc))
    tg = _pick_tile(G, per_group, align=1)

    out = pl.pallas_call(
        _grouped_pool_kernel,
        out_shape=jax.ShapeDtypeStruct((G, H_out, W), x.dtype),
        grid=(pl.cdiv(G, tg),),
        in_specs=[pl.BlockSpec((tg, kc * H_out, kh * W), lambda g: (g, 0, 0))],
        out_specs=pl.BlockSpec((tg, H_out, W), lambda g: (g, 0, 0)),
        compiler_params=pltpu.CompilerParams(
            dimension_semantics=("parallel",),
            vmem_limit_bytes=_VMEM_LIMIT),
        cost_estimate=pl.CostEstimate(
            flops=(kc * kh - 1) * G * H_out * W,
            transcendentals=0,
            bytes_accessed=(kc * kh + 1) * G * H_out * W * itemsize),
    )(xg)
    return out.reshape(B, C_out, H_out, W)


# --------------------------------- public API ---------------------------------

def channel_max_pooling(x, kernel_size, stride=None):
    """Pallas equivalent of Channel_Max_Pooling(kernel_size, stride).forward(x).

    x: (N, C, H, W).  Pooling runs over (H, C): kernel_size[0] over H, kernel_size[1]
    over C, W untouched — matching transpose(1,3) + MaxPool2d + transpose(1,3)
    (padding=0, dilation=1, ceil_mode=False)."""
    kh, kc = _pair(kernel_size)
    sh, sc = _pair(kernel_size if stride is None else stride)
    if kh == 1 and sh == 1 and sc == kc:
        return _channel_max_pool(x, kc)                 # MMSMCNet's configuration
    if sh == kh and sc == kc:
        return _grouped_max_pool(x, kh, kc)
    # TODO(synk): overlapping / gapped windows (stride != kernel_size) have no clean
    # contiguous block decomposition; those rare configs fall back to XLA reduce_window.
    return channel_max_pooling_ref(x, kernel_size, stride)


# ----------------------------- pure-JAX reference ------------------------------

def channel_max_pooling_ref(x, kernel_size, stride=None):
    kh, kc = _pair(kernel_size)
    sh, sc = _pair(kernel_size if stride is None else stride)
    return jax.lax.reduce_window(
        x, _min_value(x.dtype), jax.lax.max,
        window_dimensions=(1, kc, kh, 1),
        window_strides=(1, sc, sh, 1),
        padding="VALID")


# ----------------------------------- main --------------------------------------

if __name__ == "__main__":
    key = jax.random.PRNGKey(0)
    B, C, H, W = 2, 64, 16, 16
    x = jax.random.normal(key, (B, C, H, W), dtype=jnp.float32)

    pool = jax.jit(channel_max_pooling, static_argnums=(1, 2))

    # Config used in MMSMCNet: halve the channel count with pairwise channel max.
    out1 = jax.block_until_ready(pool(x, (1, 2), (1, 2)))
    ref1 = channel_max_pooling_ref(x, (1, 2), (1, 2))
    assert out1.shape == (B, C // 2, H, W), out1.shape
    assert bool(jnp.array_equal(out1, ref1)), "channel-pool (lane-dense) mismatch vs reference"

    # General (H, C) pooling config to exercise the grouped kernel.
    out2 = jax.block_until_ready(pool(x, (2, 2), (2, 2)))
    ref2 = channel_max_pooling_ref(x, (2, 2), (2, 2))
    assert out2.shape == (B, C // 2, H // 2, W), out2.shape
    assert bool(jnp.array_equal(out2, ref2)), "grouped path mismatch vs reference"

    # Exercise the large-feature-map (lane-tiled, accumulate-over-kc) variant at a small
    # shape by forcing a tiny VMEM budget; semantics must match the (1,2)/(1,2) config.
    out3 = jax.block_until_ready(_channel_max_pool_lane_tiled(x, 2, budget=4096))
    assert bool(jnp.array_equal(out3, ref1)), "lane-tiled path mismatch vs reference"

    print("KERNEL_OK")
</pallas_src>

<mosaic_0001>
module attributes {stable_mosaic.version = 11 : i64} {
  func.func @_channel_pool_kernel(%arg0: i32, %arg1: memref<64x512xf32, #tpu.memory_space<vmem>>, %arg2: memref<64x256xf32, #tpu.memory_space<vmem>>) attributes {dimension_semantics = [#tpu.dimension_semantics<parallel>], iteration_bounds = array<i64: 1>, scalar_prefetch = 0 : i64, scratch_operands = 0 : i64, tpu.core_type = #tpu.core_type<tc>, window_params = [{transform_indices = @transform_0, window_bounds = array<i64: 64, 512>}, {transform_indices = @transform_1, window_bounds = array<i64: 64, 256>}]} {
    %c0 = arith.constant 0 : index
    %c0_0 = arith.constant 0 : index
    %0 = vector.load %arg1[%c0, %c0_0] : memref<64x512xf32, #tpu.memory_space<vmem>>, vector<64x256xf32>
    %c0_1 = arith.constant 0 : index
    %c256 = arith.constant 256 : index
    %1 = vector.load %arg1[%c0_1, %c256] : memref<64x512xf32, #tpu.memory_space<vmem>>, vector<64x256xf32>
    %2 = arith.maximumf %0, %1 : vector<64x256xf32>
    %c0_2 = arith.constant 0 : index
    %c0_3 = arith.constant 0 : index
    %3 = vector.load %arg2[%c0_2, %c0_3] : memref<64x256xf32, #tpu.memory_space<vmem>>, vector<64x256xf32>
    tpu.vector_store %arg2[%c0_2, %c0_3], %2 {strides = array<i32>} : memref<64x256xf32, #tpu.memory_space<vmem>>, vector<64x256xf32>,
    return
  }
  func.func @transform_0(%arg0: i32) -> (i32, i32) {
    %c0_i32 = arith.constant 0 : i32
    %c0_i32_0 = arith.constant 0 : i32
    return %arg0, %c0_i32 : i32, i32
  }
  func.func @transform_1(%arg0: i32) -> (i32, i32) {
    %c0_i32 = arith.constant 0 : i32
    %c0_i32_0 = arith.constant 0 : i32
    return %arg0, %c0_i32 : i32, i32
  }
}

</mosaic_0001>

<bundles_post_ra>
// kernel: channel_max_pooling.1
= control target key start
LH: loop header
LB: loop body
LE: loop exit
PB: predicated region body
PF: predicated region fallthrough
CT: control target
= control target key end

     0   :  { %s230_s0 = inlined_call_operand.vmem [shape: f32[64,512], index: 0, kind: input, shape index: {}]   ;;  %s231_s1 = inlined_call_operand.vmem [shape: f32[64,256], index: 1, kind: output, shape index: {}]  }
   0x1   :  { %v8_v0 = vld [vmem:[%s230_s0] sm:$0xff]  ;;  %v24_v1 = vld [vmem:[%s230_s0 + $0x10] sm:$0xff]  ;;  %v9_v2 = vld [vmem:[%s230_s0 + $0x8] sm:$0xff] }
   0x2   :  { %v40_v3 = vmax.f32 %v8_v0, %v24_v1  ;;  %v25_v4 = vld [vmem:[%s230_s0 + $0x18] sm:$0xff]  ;;  %v10_v5 = vld [vmem:[%s230_s0 + $0x20] sm:$0xff]  ;;  %v26_v6 = vld [vmem:[%s230_s0 + $0x30] sm:$0xff] }
   0x3   :  { %v41_v7 = vmax.f32 %v9_v2, %v25_v4  ;;  %v42_v8 = vmax.f32 %v10_v5, %v26_v6  ;;  %v11_v9 = vld [vmem:[%s230_s0 + $0x28] sm:$0xff]  ;;  %v27_v10 = vld [vmem:[%s230_s0 + $0x38] sm:$0xff]  ;;  %v12_v11 = vld [vmem:[%s230_s0 + $0x40] sm:$0xff] }
   0x4   :  { %56 = vst [vmem:[%s231_s1] sm:$0xff] %v40_v3  ;;  %v43_v12 = vmax.f32 %v11_v9, %v27_v10  ;;  %v28_v13 = vld [vmem:[%s230_s0 + $0x50] sm:$0xff]  ;;  %v13_v14 = vld [vmem:[%s230_s0 + $0x48] sm:$0xff]  ;;  %v29_v15 = vld [vmem:[%s230_s0 + $0x58] sm:$0xff] }
   0x5   :  { %57 = vst [vmem:[%s231_s1 + $0x8] sm:$0xff] %v41_v7  ;;  %58 = vst [vmem:[%s231_s1 + $0x10] sm:$0xff] %v42_v8  ;;  %v44_v16 = vmax.f32 %v12_v11, %v28_v13  ;;  %v45_v17 = vmax.f32 %v13_v14, %v29_v15  ;;  %v14_v18 = vld [vmem:[%s230_s0 + $0x60] sm:$0xff]  ;;  %v30_v19 = vld [vmem:[%s230_s0 + $0x70] sm:$0xff] }
   0x6   :  { %v15_v20 = vld [vmem:[%s230_s0 + $0x68] sm:$0xff]  ;;  %59 = vst [vmem:[%s231_s1 + $0x18] sm:$0xff] %v43_v12  ;;  %v46_v21 = vmax.f32 %v14_v18, %v30_v19  ;;  %v31_v22 = vld [vmem:[%s230_s0 + $0x78] sm:$0xff]  ;;  %v16_v23 = vld [vmem:[%s230_s0 + $0x80] sm:$0xff] }
   0x7   :  { %v32_v24 = vld [vmem:[%s230_s0 + $0x90] sm:$0xff]  ;;  %60 = vst [vmem:[%s231_s1 + $0x20] sm:$0xff] %v44_v16  ;;  %61 = vst [vmem:[%s231_s1 + $0x28] sm:$0xff] %v45_v17  ;;  %v47_v25 = vmax.f32 %v15_v20, %v31_v22  ;;  %v17_v27 = vld [vmem:[%s230_s0 + $0x88] sm:$0xff] }
   0x8   :  { %v48_v26 = vmax.f32 %v16_v23, %v32_v24  ;;  %v33_v28 = vld [vmem:[%s230_s0 + $0x98] sm:$0xff]  ;;  %v18_v29 = vld [vmem:[%s230_s0 + $0xa0] sm:$0xff]  ;;  %62 = vst [vmem:[%s231_s1 + $0x30] sm:$0xff] %v46_v21  ;;  %v34_v31 = vld [vmem:[%s230_s0 + $0xb0] sm:$0xff] }
   0x9   :  { %v49_v30 = vmax.f32 %v17_v27, %v33_v28  ;;  %v19_v32 = vld [vmem:[%s230_s0 + $0xa8] sm:$0xff]  ;;  %v35_v33 = vld [vmem:[%s230_s0 + $0xb8] sm:$0xff]  ;;  %63 = vst [vmem:[%s231_s1 + $0x38] sm:$0xff] %v47_v25  ;;  %v50_v34 = vmax.f32 %v18_v29, %v34_v31  ;;  %v20_v36 = vld [vmem:[%s230_s0 + $0xc0] sm:$0xff] }
   0xa   :  { %64 = vst [vmem:[%s231_s1 + $0x40] sm:$0xff] %v48_v26  ;;  %v51_v35 = vmax.f32 %v19_v32, %v35_v33  ;;  %v36_v37 = vld [vmem:[%s230_s0 + $0xd0] sm:$0xff]  ;;  %v21_v38 = vld [vmem:[%s230_s0 + $0xc8] sm:$0xff]  ;;  %v37_v40 = vld [vmem:[%s230_s0 + $0xd8] sm:$0xff] }
   0xb   :  { %65 = vst [vmem:[%s231_s1 + $0x48] sm:$0xff] %v49_v30  ;;  %v52_v39 = vmax.f32 %v20_v36, %v36_v37  ;;  %v22_v41 = vld [vmem:[%s230_s0 + $0xe0] sm:$0xff]  ;;  %v38_v42 = vld [vmem:[%s230_s0 + $0xf0] sm:$0xff]  ;;  %66 = vst [vmem:[%s231_s1 + $0x50] sm:$0xff] %v50_v34  ;;  %v53_v43 = vmax.f32 %v21_v38, %v37_v40 }
   0xc   :  { %67 = vst [vmem:[%s231_s1 + $0x58] sm:$0xff] %v51_v35  ;;  %v54_v44 = vmax.f32 %v22_v41, %v38_v42  ;;  %v23_v45 = vld [vmem:[%s230_s0 + $0xe8] sm:$0xff]  ;;  %v39_v46 = vld [vmem:[%s230_s0 + $0xf8] sm:$0xff] }
   0xd   :  { %68 = vst [vmem:[%s231_s1 + $0x60] sm:$0xff] %v52_v39  ;;  %v55_v47 = vmax.f32 %v23_v45, %v39_v46  ;;  %69 = vst [vmem:[%s231_s1 + $0x68] sm:$0xff] %v53_v43 }
   0xe   :  { %70 = vst [vmem:[%s231_s1 + $0x70] sm:$0xff] %v54_v44 }
   0xf   :  { %71 = vst [vmem:[%s231_s1 + $0x78] sm:$0xff] %v55_v47 }

</bundles_post_ra>
